<compile_context>
chip_gen: v7x
topology: tpu7x:2x2x1
jax: 0.10.0
libtpu: 0.0.40
codegen_flags: <defaults>
</compile_context>

<pallas_src>
import jax
import jax.numpy as jnp
from jax.experimental import pallas as pl
from jax.experimental.pallas import tpu as pltpu

_LANE = 128
_SUBLANE = 8


def _round_up(x, m):
    return ((x + m - 1) // m) * m


def _sublane_tile(itemsize):
    # Second-minor tiling granularity: 8 rows for 4-byte, 16 for 2-byte, 32 for 1-byte.
    return _SUBLANE * max(1, 4 // max(1, itemsize))


def _vmem_capacity_bytes():
    try:
        return int(pltpu.get_tpu_info().vmem_capacity_bytes)
    except Exception:
        return 64 << 20  # conservative: v7x per-TC physical VMEM


# --------------------------------------------------------------------------- #
# Kernel
# --------------------------------------------------------------------------- #
def prediction_kernel(va_ref, vb_ref, w1_ref, b1_ref, w2_ref, b2_ref, out_ref):
    """Per-batch-tile: pooling + (implicit) concat + 2-layer MLP."""
    La = va_ref.shape[1]
    Lb = vb_ref.shape[1]
    D = va_ref.shape[2]

    va = va_ref[...]                                    # native dtype, no f32 copy
    vb = vb_ref[...]

    # Pooling over the sequence axis (matches torch .sum(1)/L and .max(1)[0]).
    va_avg = jnp.sum(va, axis=1, dtype=jnp.float32) * (1.0 / La)   # [TB, D] f32
    vb_avg = jnp.sum(vb, axis=1, dtype=jnp.float32) * (1.0 / Lb)
    va_max = jnp.max(va, axis=1)                                   # [TB, D] native dtype
    vb_max = jnp.max(vb, axis=1)

    # Dropout(p): identity in eval mode.

    # concat([va_avg, va_max, vb_avg, vb_max]) @ w1 == sum of four static
    # row-slices of w1 (no cross-lane concat); MXU operands use the weight
    # dtype, accumulation stays f32.
    wdt = w1_ref.dtype
    pre = jnp.dot(va_avg.astype(wdt), w1_ref[0 * D:1 * D, :],
                  preferred_element_type=jnp.float32)
    pre = pre + jnp.dot(va_max.astype(wdt), w1_ref[1 * D:2 * D, :],
                        preferred_element_type=jnp.float32)
    pre = pre + jnp.dot(vb_avg.astype(wdt), w1_ref[2 * D:3 * D, :],
                        preferred_element_type=jnp.float32)
    pre = pre + jnp.dot(vb_max.astype(wdt), w1_ref[3 * D:4 * D, :],
                        preferred_element_type=jnp.float32)

    h = jnp.tanh(pre + b1_ref[...].astype(jnp.float32))            # [TB, hidden]

    out = jnp.dot(h.astype(w2_ref.dtype), w2_ref[...],
                  preferred_element_type=jnp.float32)
    out = out + b2_ref[...].astype(jnp.float32)
    out_ref[...] = out.astype(out_ref.dtype)                       # [TB, out_pad] lane-dense


# --------------------------------------------------------------------------- #
# One-time parameter preparation (hoisted out of the per-call path)
# --------------------------------------------------------------------------- #
def prepare_params(w1, b1, w2, b2):
    """w1: [4*D, hidden] (torch weight.T), b1: [hidden] or [1, hidden],
    w2: [hidden, type_num] (torch weight.T), b2: [type_num] or [1, type_num].
    Lane-pads the output projection to a multiple of 128 so the kernel's
    output writes are unmasked full-lane stores."""
    hidden, type_num = w2.shape
    out_pad = _round_up(max(type_num, _LANE), _LANE)
    w2_p = jnp.pad(w2, ((0, 0), (0, out_pad - type_num)))
    b2_p = jnp.pad(jnp.reshape(b2, (1, -1)), ((0, 0), (0, out_pad - type_num)))
    return dict(w1=w1, b1=jnp.reshape(b1, (1, -1)), w2=w2_p, b2=b2_p,
                type_num=int(type_num))


# --------------------------------------------------------------------------- #
# Wrapper
# --------------------------------------------------------------------------- #
def prediction_forward(v_a, v_b, params, *, block_batch=None):
    w1 = params["w1"]
    b1 = params["b1"]
    w2_p = params["w2"]
    b2_p = params["b2"]
    type_num = params["type_num"]

    B, La, D = v_a.shape
    Bb, Lb, Db = v_b.shape
    assert Bb == B and Db == D
    concat_size, hidden = w1.shape
    assert concat_size == 4 * D
    hidden2, out_pad = w2_p.shape
    assert hidden2 == hidden and out_pad % _LANE == 0

    in_itemsize = jnp.dtype(v_a.dtype).itemsize
    w_itemsize = jnp.dtype(w1.dtype).itemsize
    out_dtype = v_a.dtype
    out_itemsize = jnp.dtype(out_dtype).itemsize

    # --- (8,128)-layout-aware VMEM footprints (not compact HBM bytes). ---
    d_pad = _round_up(D, _LANE)
    seq_tile = _sublane_tile(in_itemsize)
    la_pad = _round_up(La, seq_tile)
    lb_pad = _round_up(Lb, seq_tile)
    per_row_vmem = (la_pad + lb_pad) * d_pad * in_itemsize

    w_sub = _sublane_tile(w_itemsize)
    h_pad = _round_up(hidden, _LANE)
    param_vmem = ((_round_up(4 * D, w_sub) + w_sub) * h_pad
                  + (_round_up(hidden, w_sub) + w_sub) * out_pad) * w_itemsize

    vmem_cap = _vmem_capacity_bytes()
    vmem_target = max(16 << 20, (vmem_cap * 3) // 4)   # ~48 MiB on v7x, ~96 MiB v5e/v6e

    # --- batch tile: sublane aligned, sized so the double-buffered input
    # tiles fit in the generation-aware budget; >=2 grid steps when possible. ---
    if block_batch is None:
        input_budget = max(2 << 20,
                           min(28 << 20, vmem_target - param_vmem - (4 << 20)))
        tb = input_budget // max(1, 2 * per_row_vmem)
        tb = max(_SUBLANE, (tb // _SUBLANE) * _SUBLANE)
        block_batch = int(min(_round_up(B, _SUBLANE), tb))
    TB = _round_up(max(int(block_batch), _SUBLANE), _SUBLANE)
    if B > _SUBLANE:
        # Guarantee >= 2 grid steps so "parallel" can shard across v7x's 2 TCs.
        TB = min(TB, _round_up(-(-B // 2), _SUBLANE))

    B_pad = _round_up(B, TB)
    if B_pad != B:
        # Padded batch rows are garbage-in/garbage-out; sliced off below.
        v_a = jnp.pad(v_a, ((0, B_pad - B), (0, 0), (0, 0)))
        v_b = jnp.pad(v_b, ((0, B_pad - B), (0, 0), (0, 0)))

    grid = (B_pad // TB,)

    cost = pl.CostEstimate(
        flops=2 * B_pad * (4 * D * hidden + hidden * out_pad),
        transcendentals=B_pad * hidden,
        bytes_accessed=(B_pad * (La + Lb) * D * in_itemsize
                        + (4 * D * hidden + hidden + hidden * out_pad + out_pad) * w_itemsize
                        + B_pad * out_pad * out_itemsize),
    )

    def _run(single_buffer_params):
        def _param_spec(shape):
            zeros = (0,) * len(shape)
            if single_buffer_params:
                return pl.BlockSpec(shape, lambda i, _z=zeros: _z,
                                    pipeline_mode=pl.Buffered(1))
            return pl.BlockSpec(shape, lambda i, _z=zeros: _z)

        in_specs = [
            pl.BlockSpec((TB, La, D), lambda i: (i, 0, 0)),
            pl.BlockSpec((TB, Lb, D), lambda i: (i, 0, 0)),
            _param_spec((4 * D, hidden)),
            _param_spec((1, hidden)),
            _param_spec((hidden, out_pad)),
            _param_spec((1, out_pad)),
        ]
        out_specs = pl.BlockSpec((TB, out_pad), lambda i: (i, 0))

        nbuf = 1 if single_buffer_params else 2
        vmem_est = (2 * TB * (la_pad + lb_pad) * d_pad * in_itemsize   # 2 pipeline buffers
                    + nbuf * param_vmem
                    + 2 * TB * out_pad * out_itemsize
                    + (2 << 20))                                       # Mosaic scratch headroom
        vmem_limit = int(min(vmem_target, max(8 << 20, vmem_est)))

        return pl.pallas_call(
            prediction_kernel,
            out_shape=jax.ShapeDtypeStruct((B_pad, out_pad), out_dtype),
            grid=grid,
            in_specs=in_specs,
            out_specs=out_specs,
            compiler_params=pltpu.CompilerParams(
                dimension_semantics=("parallel",),
                vmem_limit_bytes=vmem_limit,
            ),
            cost_estimate=cost,
        )(v_a, v_b, w1, b1, w2_p, b2_p)

    try:
        out_padded = _run(True)
    except Exception:
        # Fallback for JAX versions that reject pl.Buffered(1) on resident params.
        out_padded = _run(False)

    return out_padded[:B, :type_num]


def reference_forward(v_a, v_b, w1, b1, w2, b2):
    """Pure-JAX reference of the PyTorch forward (eval-mode dropout)."""
    va_avg = v_a.sum(1) / v_a.shape[1]
    va_max = v_a.max(1)
    vb_avg = v_b.sum(1) / v_b.shape[1]
    vb_max = v_b.max(1)
    v = jnp.concatenate([va_avg, va_max, vb_avg, vb_max], axis=-1)
    h = jnp.tanh(v @ w1 + b1.reshape(1, -1))
    return h @ w2 + b2.reshape(1, -1)


if __name__ == "__main__":
    # Small shapes consistent with the module:
    #   B=2 batch, L=8 seq, D=32 features -> concat_size = 4*D = 128
    #   hidden_size=32, type_num=4
    B, L, D = 2, 8, 32
    concat_size = 4 * D
    hidden_size = 32
    type_num = 4

    key = jax.random.PRNGKey(0)
    k_va, k_vb, k_w1, k_b1, k_w2, k_b2 = jax.random.split(key, 6)

    v_a = jax.random.normal(k_va, (B, L, D), dtype=jnp.float32)
    v_b = jax.random.normal(k_vb, (B, L, D), dtype=jnp.float32)

    # Deterministic parameters in [in, out] layout (i.e. PyTorch weight.T).
    w1 = jax.random.normal(k_w1, (concat_size, hidden_size), dtype=jnp.float32) * 0.05
    b1 = jax.random.normal(k_b1, (1, hidden_size), dtype=jnp.float32) * 0.05
    w2 = jax.random.normal(k_w2, (hidden_size, type_num), dtype=jnp.float32) * 0.05
    b2 = jax.random.normal(k_b2, (1, type_num), dtype=jnp.float32) * 0.05

    params = prepare_params(w1, b1, w2, b2)   # one-time prep, not per-call

    out = prediction_forward(v_a, v_b, params)
    out = jax.block_until_ready(out)

    ref = reference_forward(v_a, v_b, w1, b1, w2, b2)
    assert out.shape == (B, type_num), out.shape
    assert jnp.allclose(out, ref, atol=1e-5, rtol=1e-5), (out, ref)

    print("KERNEL_OK")
</pallas_src>

<mosaic_0001>
module attributes {stable_mosaic.version = 11 : i64} {
  func.func @prediction_kernel(%arg0: i32, %arg1: memref<8x8x32xf32, #tpu.memory_space<vmem>>, %arg2: memref<8x8x32xf32, #tpu.memory_space<vmem>>, %arg3: memref<128x32xf32, #tpu.memory_space<vmem>>, %arg4: memref<1x32xf32, #tpu.memory_space<vmem>>, %arg5: memref<32x128xf32, #tpu.memory_space<vmem>>, %arg6: memref<1x128xf32, #tpu.memory_space<vmem>>, %arg7: memref<8x128xf32, #tpu.memory_space<vmem>>) attributes {dimension_semantics = [#tpu.dimension_semantics<parallel>], iteration_bounds = array<i64: 1>, scalar_prefetch = 0 : i64, scratch_operands = 0 : i64, tpu.core_type = #tpu.core_type<tc>, window_params = [{transform_indices = @transform_0, window_bounds = array<i64: 8, 8, 32>}, {transform_indices = @transform_1, window_bounds = array<i64: 8, 8, 32>}, {pipeline_mode = #tpu.pipeline_mode<synchronous>, transform_indices = @transform_2, window_bounds = array<i64: 128, 32>}, {pipeline_mode = #tpu.pipeline_mode<synchronous>, transform_indices = @transform_3, window_bounds = array<i64: 1, 32>}, {pipeline_mode = #tpu.pipeline_mode<synchronous>, transform_indices = @transform_4, window_bounds = array<i64: 32, 128>}, {pipeline_mode = #tpu.pipeline_mode<synchronous>, transform_indices = @transform_5, window_bounds = array<i64: 1, 128>}, {transform_indices = @transform_6, window_bounds = array<i64: 8, 128>}]} {
    %c0 = arith.constant 0 : index
    %c0_0 = arith.constant 0 : index
    %c0_1 = arith.constant 0 : index
    %0 = vector.load %arg1[%c0, %c0_0, %c0_1] : memref<8x8x32xf32, #tpu.memory_space<vmem>>, vector<8x8x32xf32>
    %c0_2 = arith.constant 0 : index
    %c0_3 = arith.constant 0 : index
    %c0_4 = arith.constant 0 : index
    %1 = vector.load %arg2[%c0_2, %c0_3, %c0_4] : memref<8x8x32xf32, #tpu.memory_space<vmem>>, vector<8x8x32xf32>
    %cst = arith.constant dense<0.000000e+00> : vector<8x32xf32>
    %2 = vector.multi_reduction <add>, %0, %cst [1] : vector<8x8x32xf32> to vector<8x32xf32>
    %cst_5 = arith.constant 1.250000e-01 : f32
    %3 = vector.broadcast %cst_5 : f32 to vector<8x32xf32>
    %4 = arith.mulf %2, %3 : vector<8x32xf32>
    %cst_6 = arith.constant dense<0.000000e+00> : vector<8x32xf32>
    %5 = vector.multi_reduction <add>, %1, %cst_6 [1] : vector<8x8x32xf32> to vector<8x32xf32>
    %cst_7 = arith.constant 1.250000e-01 : f32
    %6 = vector.broadcast %cst_7 : f32 to vector<8x32xf32>
    %7 = arith.mulf %5, %6 : vector<8x32xf32>
    %cst_8 = arith.constant dense<0xFF800000> : vector<8x32xf32>
    %8 = vector.multi_reduction <maximumf>, %0, %cst_8 [1] : vector<8x8x32xf32> to vector<8x32xf32>
    %cst_9 = arith.constant dense<0xFF800000> : vector<8x32xf32>
    %9 = vector.multi_reduction <maximumf>, %1, %cst_9 [1] : vector<8x8x32xf32> to vector<8x32xf32>
    %c0_10 = arith.constant 0 : index
    %c0_11 = arith.constant 0 : index
    %10 = vector.load %arg3[%c0_10, %c0_11] : memref<128x32xf32, #tpu.memory_space<vmem>>, vector<32x32xf32>
    %cst_12 = arith.constant dense<0.000000e+00> : vector<8x32xf32>
    %11 = tpu.matmul %4, %10, %cst_12 {dimension_numbers = #tpu.dot_dimension_numbers<[1], [0], [0], [1], [0, 0, 1, 1], [], []>} : vector<8x32xf32>, vector<32x32xf32>, vector<8x32xf32> -> vector<8x32xf32>
    %c32 = arith.constant 32 : index
    %c0_13 = arith.constant 0 : index
    %12 = vector.load %arg3[%c32, %c0_13] : memref<128x32xf32, #tpu.memory_space<vmem>>, vector<32x32xf32>
    %cst_14 = arith.constant dense<0.000000e+00> : vector<8x32xf32>
    %13 = tpu.matmul %8, %12, %cst_14 {dimension_numbers = #tpu.dot_dimension_numbers<[1], [0], [0], [1], [0, 0, 1, 1], [], []>} : vector<8x32xf32>, vector<32x32xf32>, vector<8x32xf32> -> vector<8x32xf32>
    %14 = arith.addf %11, %13 : vector<8x32xf32>
    %c64 = arith.constant 64 : index
    %c0_15 = arith.constant 0 : index
    %15 = vector.load %arg3[%c64, %c0_15] : memref<128x32xf32, #tpu.memory_space<vmem>>, vector<32x32xf32>
    %cst_16 = arith.constant dense<0.000000e+00> : vector<8x32xf32>
    %16 = tpu.matmul %7, %15, %cst_16 {dimension_numbers = #tpu.dot_dimension_numbers<[1], [0], [0], [1], [0, 0, 1, 1], [], []>} : vector<8x32xf32>, vector<32x32xf32>, vector<8x32xf32> -> vector<8x32xf32>
    %17 = arith.addf %14, %16 : vector<8x32xf32>
    %c96 = arith.constant 96 : index
    %c0_17 = arith.constant 0 : index
    %18 = vector.load %arg3[%c96, %c0_17] : memref<128x32xf32, #tpu.memory_space<vmem>>, vector<32x32xf32>
    %cst_18 = arith.constant dense<0.000000e+00> : vector<8x32xf32>
    %19 = tpu.matmul %9, %18, %cst_18 {dimension_numbers = #tpu.dot_dimension_numbers<[1], [0], [0], [1], [0, 0, 1, 1], [], []>} : vector<8x32xf32>, vector<32x32xf32>, vector<8x32xf32> -> vector<8x32xf32>
    %20 = arith.addf %17, %19 : vector<8x32xf32>
    %c0_19 = arith.constant 0 : index
    %c0_20 = arith.constant 0 : index
    %21 = vector.load %arg4[%c0_19, %c0_20] : memref<1x32xf32, #tpu.memory_space<vmem>>, vector<1x32xf32>
    %22 = vector.broadcast %21 : vector<1x32xf32> to vector<8x32xf32>
    %23 = arith.addf %20, %22 : vector<8x32xf32>
    %24 = math.tanh %23 : vector<8x32xf32>
    %c0_21 = arith.constant 0 : index
    %c0_22 = arith.constant 0 : index
    %25 = vector.load %arg5[%c0_21, %c0_22] : memref<32x128xf32, #tpu.memory_space<vmem>>, vector<32x128xf32>
    %cst_23 = arith.constant dense<0.000000e+00> : vector<8x128xf32>
    %26 = tpu.matmul %24, %25, %cst_23 {dimension_numbers = #tpu.dot_dimension_numbers<[1], [0], [0], [1], [0, 0, 1, 1], [], []>} : vector<8x32xf32>, vector<32x128xf32>, vector<8x128xf32> -> vector<8x128xf32>
    %c0_24 = arith.constant 0 : index
    %c0_25 = arith.constant 0 : index
    %27 = vector.load %arg6[%c0_24, %c0_25] : memref<1x128xf32, #tpu.memory_space<vmem>>, vector<1x128xf32>
    %28 = vector.broadcast %27 : vector<1x128xf32> to vector<8x128xf32>
    %29 = arith.addf %26, %28 : vector<8x128xf32>
    %c0_26 = arith.constant 0 : index
    %c0_27 = arith.constant 0 : index
    %30 = vector.load %arg7[%c0_26, %c0_27] : memref<8x128xf32, #tpu.memory_space<vmem>>, vector<8x128xf32>
    tpu.vector_store %arg7[%c0_26, %c0_27], %29 {strides = array<i32>} : memref<8x128xf32, #tpu.memory_space<vmem>>, vector<8x128xf32>,
    return
  }
  func.func @transform_0(%arg0: i32) -> (i32, i32, i32) {
    %c0_i32 = arith.constant 0 : i32
    %c0_i32_0 = arith.constant 0 : i32
    %c0_i32_1 = arith.constant 0 : i32
    return %arg0, %c0_i32, %c0_i32_0 : i32, i32, i32
  }
  func.func @transform_1(%arg0: i32) -> (i32, i32, i32) {
    %c0_i32 = arith.constant 0 : i32
    %c0_i32_0 = arith.constant 0 : i32
    %c0_i32_1 = arith.constant 0 : i32
    return %arg0, %c0_i32, %c0_i32_0 : i32, i32, i32
  }
  func.func @transform_2(%arg0: i32) -> (i32, i32) {
    %c0_i32 = arith.constant 0 : i32
    %c0_i32_0 = arith.constant 0 : i32
    %c0_i32_1 = arith.constant 0 : i32
    return %c0_i32, %c0_i32_0 : i32, i32
  }
  func.func @transform_3(%arg0: i32) -> (i32, i32) {
    %c0_i32 = arith.constant 0 : i32
    %c0_i32_0 = arith.constant 0 : i32
    %c0_i32_1 = arith.constant 0 : i32
    return %c0_i32, %c0_i32_0 : i32, i32
  }
  func.func @transform_4(%arg0: i32) -> (i32, i32) {
    %c0_i32 = arith.constant 0 : i32
    %c0_i32_0 = arith.constant 0 : i32
    %c0_i32_1 = arith.constant 0 : i32
    return %c0_i32, %c0_i32_0 : i32, i32
  }
  func.func @transform_5(%arg0: i32) -> (i32, i32) {
    %c0_i32 = arith.constant 0 : i32
    %c0_i32_0 = arith.constant 0 : i32
    %c0_i32_1 = arith.constant 0 : i32
    return %c0_i32, %c0_i32_0 : i32, i32
  }
  func.func @transform_6(%arg0: i32) -> (i32, i32) {
    %c0_i32 = arith.constant 0 : i32
    %c0_i32_0 = arith.constant 0 : i32
    return %arg0, %c0_i32 : i32, i32
  }
}

module attributes {stable_mosaic.version = 11 : i64} {
  func.func @prediction_kernel(%arg0: i32, %arg1: memref<8x8x32xf32, #tpu.memory_space<vmem>>, %arg2: memref<8x8x32xf32, #tpu.memory_space<vmem>>, %arg3: memref<128x32xf32, #tpu.memory_space<vmem>>, %arg4: memref<1x32xf32, #tpu.memory_space<vmem>>, %arg5: memref<32x128xf32, #tpu.memory_space<vmem>>, %arg6: memref<1x128xf32, #tpu.memory_space<vmem>>, %arg7: memref<8x128xf32, #tpu.memory_space<vmem>>) attributes {dimension_semantics = [#tpu.dimension_semantics<parallel>], iteration_bounds = array<i64: 1>, scalar_prefetch = 0 : i64, scratch_operands = 0 : i64, tpu.core_type = #tpu.core_type<tc>, window_params = [{transform_indices = @transform_0, window_bounds = array<i64: 8, 8, 32>}, {transform_indices = @transform_1, window_bounds = array<i64: 8, 8, 32>}, {pipeline_mode = #tpu.pipeline_mode<synchronous>, transform_indices = @transform_2, window_bounds = array<i64: 128, 32>}, {pipeline_mode = #tpu.pipeline_mode<synchronous>, transform_indices = @transform_3, window_bounds = array<i64: 1, 32>}, {pipeline_mode = #tpu.pipeline_mode<synchronous>, transform_indices = @transform_4, window_bounds = array<i64: 32, 128>}, {pipeline_mode = #tpu.pipeline_mode<synchronous>, transform_indices = @transform_5, window_bounds = array<i64: 1, 128>}, {transform_indices = @transform_6, window_bounds = array<i64: 8, 128>}]} {
    %c0 = arith.constant 0 : index
    %c0_0 = arith.constant 0 : index
    %c0_1 = arith.constant 0 : index
    %0 = vector.load %arg1[%c0, %c0_0, %c0_1] : memref<8x8x32xf32, #tpu.memory_space<vmem>>, vector<8x8x32xf32>
    %c0_2 = arith.constant 0 : index
    %c0_3 = arith.constant 0 : index
    %c0_4 = arith.constant 0 : index
    %1 = vector.load %arg2[%c0_2, %c0_3, %c0_4] : memref<8x8x32xf32, #tpu.memory_space<vmem>>, vector<8x8x32xf32>
    %cst = arith.constant dense<0.000000e+00> : vector<8x32xf32>
    %2 = vector.multi_reduction <add>, %0, %cst [1] : vector<8x8x32xf32> to vector<8x32xf32>
    %cst_5 = arith.constant 1.250000e-01 : f32
    %3 = vector.broadcast %cst_5 : f32 to vector<8x32xf32>
    %4 = arith.mulf %2, %3 : vector<8x32xf32>
    %cst_6 = arith.constant dense<0.000000e+00> : vector<8x32xf32>
    %5 = vector.multi_reduction <add>, %1, %cst_6 [1] : vector<8x8x32xf32> to vector<8x32xf32>
    %cst_7 = arith.constant 1.250000e-01 : f32
    %6 = vector.broadcast %cst_7 : f32 to vector<8x32xf32>
    %7 = arith.mulf %5, %6 : vector<8x32xf32>
    %cst_8 = arith.constant dense<0xFF800000> : vector<8x32xf32>
    %8 = vector.multi_reduction <maximumf>, %0, %cst_8 [1] : vector<8x8x32xf32> to vector<8x32xf32>
    %cst_9 = arith.constant dense<0xFF800000> : vector<8x32xf32>
    %9 = vector.multi_reduction <maximumf>, %1, %cst_9 [1] : vector<8x8x32xf32> to vector<8x32xf32>
    %c0_10 = arith.constant 0 : index
    %c0_11 = arith.constant 0 : index
    %10 = vector.load %arg3[%c0_10, %c0_11] : memref<128x32xf32, #tpu.memory_space<vmem>>, vector<32x32xf32>
    %cst_12 = arith.constant dense<0.000000e+00> : vector<8x32xf32>
    %11 = tpu.matmul %4, %10, %cst_12 {dimension_numbers = #tpu.dot_dimension_numbers<[1], [0], [0], [1], [0, 0, 1, 1], [], []>} : vector<8x32xf32>, vector<32x32xf32>, vector<8x32xf32> -> vector<8x32xf32>
    %c32 = arith.constant 32 : index
    %c0_13 = arith.constant 0 : index
    %12 = vector.load %arg3[%c32, %c0_13] : memref<128x32xf32, #tpu.memory_space<vmem>>, vector<32x32xf32>
    %cst_14 = arith.constant dense<0.000000e+00> : vector<8x32xf32>
    %13 = tpu.matmul %8, %12, %cst_14 {dimension_numbers = #tpu.dot_dimension_numbers<[1], [0], [0], [1], [0, 0, 1, 1], [], []>} : vector<8x32xf32>, vector<32x32xf32>, vector<8x32xf32> -> vector<8x32xf32>
    %14 = arith.addf %11, %13 : vector<8x32xf32>
    %c64 = arith.constant 64 : index
    %c0_15 = arith.constant 0 : index
    %15 = vector.load %arg3[%c64, %c0_15] : memref<128x32xf32, #tpu.memory_space<vmem>>, vector<32x32xf32>
    %cst_16 = arith.constant dense<0.000000e+00> : vector<8x32xf32>
    %16 = tpu.matmul %7, %15, %cst_16 {dimension_numbers = #tpu.dot_dimension_numbers<[1], [0], [0], [1], [0, 0, 1, 1], [], []>} : vector<8x32xf32>, vector<32x32xf32>, vector<8x32xf32> -> vector<8x32xf32>
    %17 = arith.addf %14, %16 : vector<8x32xf32>
    %c96 = arith.constant 96 : index
    %c0_17 = arith.constant 0 : index
    %18 = vector.load %arg3[%c96, %c0_17] : memref<128x32xf32, #tpu.memory_space<vmem>>, vector<32x32xf32>
    %cst_18 = arith.constant dense<0.000000e+00> : vector<8x32xf32>
    %19 = tpu.matmul %9, %18, %cst_18 {dimension_numbers = #tpu.dot_dimension_numbers<[1], [0], [0], [1], [0, 0, 1, 1], [], []>} : vector<8x32xf32>, vector<32x32xf32>, vector<8x32xf32> -> vector<8x32xf32>
    %20 = arith.addf %17, %19 : vector<8x32xf32>
    %c0_19 = arith.constant 0 : index
    %c0_20 = arith.constant 0 : index
    %21 = vector.load %arg4[%c0_19, %c0_20] : memref<1x32xf32, #tpu.memory_space<vmem>>, vector<1x32xf32>
    %22 = vector.broadcast %21 : vector<1x32xf32> to vector<8x32xf32>
    %23 = arith.addf %20, %22 : vector<8x32xf32>
    %24 = math.tanh %23 : vector<8x32xf32>
    %c0_21 = arith.constant 0 : index
    %c0_22 = arith.constant 0 : index
    %25 = vector.load %arg5[%c0_21, %c0_22] : memref<32x128xf32, #tpu.memory_space<vmem>>, vector<32x128xf32>
    %cst_23 = arith.constant dense<0.000000e+00> : vector<8x128xf32>
    %26 = tpu.matmul %24, %25, %cst_23 {dimension_numbers = #tpu.dot_dimension_numbers<[1], [0], [0], [1], [0, 0, 1, 1], [], []>} : vector<8x32xf32>, vector<32x128xf32>, vector<8x128xf32> -> vector<8x128xf32>
    %c0_24 = arith.constant 0 : index
    %c0_25 = arith.constant 0 : index
    %27 = vector.load %arg6[%c0_24, %c0_25] : memref<1x128xf32, #tpu.memory_space<vmem>>, vector<1x128xf32>
    %28 = vector.broadcast %27 : vector<1x128xf32> to vector<8x128xf32>
    %29 = arith.addf %26, %28 : vector<8x128xf32>
    %c0_26 = arith.constant 0 : index
    %c0_27 = arith.constant 0 : index
    %30 = vector.load %arg7[%c0_26, %c0_27] : memref<8x128xf32, #tpu.memory_space<vmem>>, vector<8x128xf32>
    tpu.vector_store %arg7[%c0_26, %c0_27], %29 {strides = array<i32>} : memref<8x128xf32, #tpu.memory_space<vmem>>, vector<8x128xf32>,
    return
  }
  func.func @transform_0(%arg0: i32) -> (i32, i32, i32) {
    %c0_i32 = arith.constant 0 : i32
    %c0_i32_0 = arith.constant 0 : i32
    %c0_i32_1 = arith.constant 0 : i32
    return %arg0, %c0_i32, %c0_i32_0 : i32, i32, i32
  }
  func.func @transform_1(%arg0: i32) -> (i32, i32, i32) {
    %c0_i32 = arith.constant 0 : i32
    %c0_i32_0 = arith.constant 0 : i32
    %c0_i32_1 = arith.constant 0 : i32
    return %arg0, %c0_i32, %c0_i32_0 : i32, i32, i32
  }
  func.func @transform_2(%arg0: i32) -> (i32, i32) {
    %c0_i32 = arith.constant 0 : i32
    %c0_i32_0 = arith.constant 0 : i32
    %c0_i32_1 = arith.constant 0 : i32
    return %c0_i32, %c0_i32_0 : i32, i32
  }
  func.func @transform_3(%arg0: i32) -> (i32, i32) {
    %c0_i32 = arith.constant 0 : i32
    %c0_i32_0 = arith.constant 0 : i32
    %c0_i32_1 = arith.constant 0 : i32
    return %c0_i32, %c0_i32_0 : i32, i32
  }
  func.func @transform_4(%arg0: i32) -> (i32, i32) {
    %c0_i32 = arith.constant 0 : i32
    %c0_i32_0 = arith.constant 0 : i32
    %c0_i32_1 = arith.constant 0 : i32
    return %c0_i32, %c0_i32_0 : i32, i32
  }
  func.func @transform_5(%arg0: i32) -> (i32, i32) {
    %c0_i32 = arith.constant 0 : i32
    %c0_i32_0 = arith.constant 0 : i32
    %c0_i32_1 = arith.constant 0 : i32
    return %c0_i32, %c0_i32_0 : i32, i32
  }
  func.func @transform_6(%arg0: i32) -> (i32, i32) {
    %c0_i32 = arith.constant 0 : i32
    %c0_i32_0 = arith.constant 0 : i32
    return %arg0, %c0_i32 : i32, i32
  }
}

</mosaic_0001>

<bundles_post_ra>
// kernel: tpu_custom_call.1
= control target key start
LH: loop header
LB: loop body
LE: loop exit
PB: predicated region body
PF: predicated region fallthrough
CT: control target
= control target key end

     0   :  { %v909_v3 = vmov 0.0|0.0   ;;  %vm40_vm0 = vcmask 261120   ;;  %vm910_vm1 = vmmov 0   ;;  %v911_v11 = vmov 0.0   ;;  %s1235_s0 = inlined_call_operand.vmem [shape: f32[8,8,32], index: 0, kind: input, shape index: {}]   ;;  %s1236_s1 = inlined_call_operand.vmem [shape: f32[8,8,32], index: 1, kind: input, shape index: {}]   ;;  %s1237_s2 = inlined_call_operand.vmem [shape: f32[128,32], index: 2, kind: input, shape index: {}]   ;;  %s1238_s3 = inlined_call_operand.vmem [shape: f32[1,32], index: 3, kind: input, shape index: {}]   ;;  %s1239_s4 = inlined_call_operand.vmem [shape: f32[32,128], index: 4, kind: input, shape index: {}]   ;;  %s1240_s5 = inlined_call_operand.vmem [shape: f32[1,128], index: 5, kind: input, shape index: {}]   ;;  %s1241_s6 = inlined_call_operand.hbm [shape: f32[8,128], index: 6, kind: output, shape index: {}]  }
   0x1   :  { %v285_v0 = vld [vmem:[%s1237_s2 + $0x20] sm:$0xff]  ;;  %v286_v1 = vld [vmem:[%s1237_s2 + $0x28] sm:$0xff]  ;;  %849 = vmatprep.subr.bf16.mxu0 %v909_v3  ;;  %855 = vmatprep.subr.bf16.mxu1 %v909_v3  ;;  %v287_v6 = vld [vmem:[%s1237_s2 + $0x30] sm:$0xff]  ;;  %vm297_vm2 = vcmask 1041409   ;;  %vm299_vm3 = vcmask 1042434   ;;  %vm301_vm4 = vcmask 1043459  }
   0x2   :  { %v281_v2 = vld [vmem:[%s1237_s2] sm:$0xff]  ;;  %v850_v4 = vpack.c.bf16 %v286_v1, %v285_v0  ;;  %v282_v5 = vld [vmem:[%s1237_s2 + $0x8] sm:$0xff]  ;;  %v288_v7 = vld [vmem:[%s1237_s2 + $0x38] sm:$0xff]  ;;  %802 = vmatprep.mubr.msk.f32.mxu0 %vm910_vm1, %v911_v11  ;;  %813 = vmatprep.mubr.msk.f32.mxu1 %vm910_vm1, %v911_v11  ;;  %vm303_vm5 = vcmask 1044484   ;;  %vm305_vm6 = vcmask 1045509   ;;  %vm307_vm7 = vcmask 1046534  }
   0x3   :  { %v856_v8 = vpack.c.bf16 %v282_v5, %v281_v2  ;;  %v283_v9 = vld [vmem:[%s1237_s2 + $0x10] sm:$0xff]  ;;  %v284_v10 = vld [vmem:[%s1237_s2 + $0x18] sm:$0xff]  ;;  %v979_v12 = vld [vmem:[%s1235_s0] sm:$0xff]  ;;  %v853_v13 = vpack.c.bf16 %v288_v7, %v287_v6 }
   0x4   :  { %851 = vmatpush3.bf16.msra.mxu0 %v850_v4  ;;  %v986_v14 = vld [vmem:[%s1235_s0 + $0x8] sm:$0xff]  ;;  %v991_v15 = vld [vmem:[%s1235_s0 + $0x10] sm:$0xff]  ;;  %v996_v16 = vld [vmem:[%s1235_s0 + $0x18] sm:$0xff]  ;;  %v169_v17 = vsel %vm40_vm0, %v979_v12, -inf  ;;  %v859_v18 = vpack.c.bf16 %v284_v10, %v283_v9 }
   0x5   :  { %857 = vmatpush3.bf16.msra.mxu1 %v856_v8  ;;  %852 = vmatprep.subr.bf16.mxu0 %v909_v3  ;;  %v1004_v19 = vld [vmem:[%s1235_s0 + $0x20] sm:$0xff]  ;;  %v1009_v20 = vld [vmem:[%s1235_s0 + $0x28] sm:$0xff]  ;;  %v1014_v21 = vld [vmem:[%s1235_s0 + $0x30] sm:$0xff]  ;;  %v170_v22 = vrot.slane %v169_v17, 4  ;;  %v176_v23 = vsel %vm40_vm0, %v986_v14, -inf  ;;  %v183_v24 = vsel %vm40_vm0, %v991_v15, -inf }
   0x6   :  { %858 = vmatprep.subr.bf16.mxu1 %v909_v3  ;;  %v177_v25 = vrot.slane %v176_v23, 4  ;;  %v184_v26 = vrot.slane %v183_v24, 4  ;;  %v190_v27 = vsel %vm40_vm0, %v996_v16, -inf  ;;  %v197_v28 = vsel %vm40_vm0, %v1004_v19, -inf  ;;  %v1028_v29 = vld [vmem:[%s1235_s0 + $0x38] sm:$0xff] }
   0x7   :  { %v171_v30 = vmax.f32 %v169_v17, %v170_v22  ;;  %v191_v31 = vrot.slane %v190_v27, 4  ;;  %v198_v32 = vrot.slane %v197_v28, 4  ;;  %v204_v33 = vsel %vm40_vm0, %v1009_v20, -inf }
   0x8   :  { %854 = vmatpush3.bf16.msra.mxu0 %v853_v13  ;;  %v178_v34 = vmax.f32 %v176_v23, %v177_v25  ;;  %v185_v35 = vmax.f32 %v183_v24, %v184_v26  ;;  %v205_v36 = vrot.slane %v204_v33, 4  ;;  %v211_v37 = vsel %vm40_vm0, %v1014_v21, -inf }
   0x9   :  { %860 = vmatpush3.bf16.msra.mxu1 %v859_v18  ;;  %861 = vmatprep.subr.bf16.mxu0 %v909_v3  ;;  %v172_v38 = vrot.slane %v171_v30, 2  ;;  %v192_v39 = vmax.f32 %v190_v27, %v191_v31  ;;  %v199_v40 = vmax.f32 %v197_v28, %v198_v32  ;;  %v212_v41 = vrot.slane %v211_v37, 4 }
   0xa   :  { %v179_v42 = vrot.slane %v178_v34, 2  ;;  %v186_v43 = vrot.slane %v185_v35, 2  ;;  %v206_v44 = vmax.f32 %v204_v33, %v205_v36  ;;  %v218_v45 = vsel %vm40_vm0, %v1028_v29, -inf  ;;  %867 = vmatprep.subr.bf16.mxu1 %v909_v3 }
   0xb   :  { %v173_v46 = vmax.f32 %v171_v30, %v172_v38  ;;  %v193_v47 = vrot.slane %v192_v39, 2  ;;  %v200_v48 = vrot.slane %v199_v40, 2  ;;  %v213_v49 = vmax.f32 %v211_v37, %v212_v41 }
   0xc   :  { %v180_v50 = vmax.f32 %v178_v34, %v179_v42  ;;  %v187_v51 = vmax.f32 %v185_v35, %v186_v43  ;;  %v207_v52 = vrot.slane %v206_v44, 2  ;;  %v219_v53 = vrot.slane %v218_v45, 4 }
   0xd   :  { %11 = vsyncpa [#allocation3], 0  ;;  %v174_v54 = vrot.slane %v173_v46, 1  ;;  %v194_v55 = vmax.f32 %v192_v39, %v193_v47  ;;  %v201_v56 = vmax.f32 %v199_v40, %v200_v48  ;;  %v214_v57 = vrot.slane %v213_v49, 2  ;;  %v470_v2 = vld [vmem:[%s1237_s2 + $0x40] sm:$0xff]  ;;  %v471_v4 = vld [vmem:[%s1237_s2 + $0x48] sm:$0xff] }
   0xe   :  { %v181_v58 = vrot.slane %v180_v50, 1  ;;  %v188_v59 = vrot.slane %v187_v51, 1  ;;  %v208_v60 = vmax.f32 %v206_v44, %v207_v52  ;;  %v220_v61 = vmax.f32 %v218_v45, %v219_v53  ;;  %s912_s20 = smov [#allocation2]  }
   0xf   :  { %v175_v62 = vmax.f32 %v173_v46, %v174_v54  ;;  %v195_v63 = vrot.slane %v194_v55, 1  ;;  %v202_v0 = vrot.slane %v201_v56, 1  ;;  %v215_v1 = vmax.f32 %v213_v49, %v214_v57  ;;  %s754_s21 = sshll.u32 %s912_s20, 4  ;;  %s755_s21 = int_to_ptr.vmem [resolvable:$true] %s754_s21 }
  0x10   :  { %v182_v5 = vmax.f32 %v180_v50, %v181_v58  ;;  %v189_v6 = vmax.f32 %v187_v51, %v188_v59  ;;  %v209_v7 = vrot.slane %v208_v60, 1  ;;  %v221_v8 = vrot.slane %v220_v61, 2  ;;  %s885_s22 = scalar_lea.vmem %s755_s21, 128  ;;  %p890_p1 = scmp.lt.s32.totalorder %s755_s21, %s755_s21 }
  0x11   :  { %v196_v9 = vmax.f32 %v194_v55, %v195_v63  ;;  %v203_v10 = vmax.f32 %v201_v56, %v202_v0  ;;  %v216_v13 = vrot.slane %v215_v1, 1  ;;  %vm309_vm8 = vcmask 1047559   ;;  %p886_p0 = scmp.ne.s32.totalorder %s755_s21, %s885_s22  ;;  %p891_p2 = scmp.lt.s32.totalorder %s885_s22, %s885_s22 }
  0x12   :  { %v210_v17 = vmax.f32 %v208_v60, %v209_v7  ;;  %v222_v18 = vmax.f32 %v220_v61, %v221_v8  ;;  %v298_v22 = vsel %vm297_vm2, %v182_v5, %v175_v62  ;;  %v862_v23 = vpack.c.bf16 %v471_v4, %v470_v2  ;;  %v1079_v7 = vld [vmem:[%s1237_s2 + $0x68] sm:$0xff] }
  0x13   :  { %v217_v24 = vmax.f32 %v215_v1, %v216_v13  ;;  %v300_v25 = vsel %vm299_vm3, %v189_v6, %v298_v22  ;;  %v41_v26 = vsel %vm40_vm0, %v979_v12, 0.0  ;;  %v48_v27 = vsel %vm40_vm0, %v986_v14, 0.0  ;;  %v1074_v6 = vld [vmem:[%s1237_s2 + $0x60] sm:$0xff]  ;;  %p892_p3 = por %p891_p2, %p890_p1 }
  0x14   :  { %v223_v28 = vrot.slane %v222_v18, 1  ;;  %v302_v30 = vsel %vm301_vm4, %v196_v9, %v300_v25  ;;  %v42_v31 = vrot.slane %v41_v26, 4  ;;  %v49_v32 = vrot.slane %v48_v27, 4  ;;  %v473_v25 = vld [vmem:[%s1237_s2 + $0x58] sm:$0xff] }
  0x15   :  { %v304_v33 = vsel %vm303_vm5, %v203_v10, %v302_v30  ;;  %v55_v34 = vsel %vm40_vm0, %v991_v15, 0.0  ;;  %v62_v35 = vsel %vm40_vm0, %v996_v16, 0.0  ;;  %v69_v36 = vsel %vm40_vm0, %v1004_v19, 0.0  ;;  %p893_p4 = pnand %p892_p3, %p886_p0 }
  0x16   :  { %v224_v12 = vmax.f32 %v222_v18, %v223_v28  ;;  %v306_v37 = vsel %vm305_vm6, %v210_v17, %v304_v33  ;;  %v43_v14 = vadd.f32 %v42_v31, %v41_v26  ;;  %v50_v38 = vadd.f32 %v49_v32, %v48_v27  ;;  %v472_v17 = vld [vmem:[%s1237_s2 + $0x50] sm:$0xff]  ;;  %v1095_v27 = vld [vmem:[%s1237_s2 + $0x78] sm:$0xff]  ;;  %v1103_v33 = vld [vmem:[%s1236_s1] sm:$0xff] }
  0x17   :  { %v308_v39 = vsel %vm307_vm7, %v217_v24, %v306_v37  ;;  %v56_v40 = vrot.slane %v55_v34, 4  ;;  %v63_v41 = vrot.slane %v62_v35, 4  ;;  %v70_v42 = vrot.slane %v69_v36, 4  ;;  %v1090_v26 = vld [vmem:[%s1237_s2 + $0x70] sm:$0xff] }
  0x18   :  { %v310_v43 = vsel %vm309_vm8, %v224_v12, %v308_v39  ;;  %v44_v44 = vrot.slane %v43_v14, 2  ;;  %v51_v15 = vrot.slane %v50_v38, 2  ;;  %v76_v16 = vsel %vm40_vm0, %v1009_v20, 0.0 }
  0x19   :  { %803 = vmatmul.mubr.msk.f32.vlgmr.msra.gmra.mrb[0].mxu0 %vm40_vm0, %v310_v43  ;;  %v57_v19 = vadd.f32 %v56_v40, %v55_v34  ;;  %v64_v45 = vadd.f32 %v63_v41, %v62_v35  ;;  %v71_v46 = vadd.f32 %v70_v42, %v69_v36  ;;  %v77_v47 = vrot.slane %v76_v16, 4  ;;  %v1108_v34 = vld [vmem:[%s1236_s1 + $0x8] sm:$0xff]  ;;  %v1115_v41 = vld [vmem:[%s1236_s1 + $0x10] sm:$0xff]  ;;  %v1120_v42 = vld [vmem:[%s1236_s1 + $0x18] sm:$0xff] }
  0x1a   :  { %863 = vmatpush3.bf16.msra.mxu0 %v862_v23  ;;  %v45_v48 = vadd.f32 %v44_v44, %v43_v14  ;;  %v52_v49 = vadd.f32 %v51_v15, %v50_v38  ;;  %v83_v50 = vsel %vm40_vm0, %v1014_v21, 0.0  ;;  %v90_v51 = vsel %vm40_vm0, %v1028_v29, 0.0  ;;  %824 = vmatprep.mubr.msk.f32.mxu0 %vm910_vm1, %v911_v11 }
  0x1b   :  { %v58_v52 = vrot.slane %v57_v19, 2  ;;  %v65_v20 = vrot.slane %v64_v45, 2  ;;  %v72_v53 = vrot.slane %v71_v46, 2  ;;  %v78_v54 = vadd.f32 %v77_v47, %v76_v16  ;;  %864 = vmatprep.subr.bf16.mxu0 %v909_v3  ;;  %v1131_v47 = vld [vmem:[%s1236_s1 + $0x20] sm:$0xff] }
  0x1c   :  { %v46_v55 = vrot.slane %v45_v48, 1  ;;  %v53_v56 = vrot.slane %v52_v49, 1  ;;  %v84_v57 = vrot.slane %v83_v50, 4  ;;  %v91_v58 = vrot.slane %v90_v51, 4 }
  0x1d   :  { %v59_v59 = vadd.f32 %v58_v52, %v57_v19  ;;  %v66_v60 = vadd.f32 %v65_v20, %v64_v45  ;;  %v73_v61 = vadd.f32 %v72_v53, %v71_v46  ;;  %v79_v21 = vrot.slane %v78_v54, 2 }
  0x1e   :  { %v47_v62 = vadd.f32 %v46_v55, %v45_v48  ;;  %v54_v63 = vadd.f32 %v53_v56, %v52_v49  ;;  %v85_v29 = vadd.f32 %v84_v57, %v83_v50  ;;  %v92_v0 = vadd.f32 %v91_v58, %v90_v51  ;;  %v1137_v50 = vld [vmem:[%s1236_s1 + $0x28] sm:$0xff]  ;;  %v1148_v57 = vld [vmem:[%s1236_s1 + $0x30] sm:$0xff] }
  0x1f   :  { %v60_v1 = vrot.slane %v59_v59, 1  ;;  %v67_v2 = vrot.slane %v66_v60, 1  ;;  %v74_v4 = vrot.slane %v73_v61, 1  ;;  %v80_v5 = vadd.f32 %v79_v21, %v78_v54 }
  0x20   :  { %v86_v8 = vrot.slane %v85_v29, 2  ;;  %v93_v9 = vrot.slane %v92_v0, 2  ;;  %v97_v10 = vmul.f32 0.125, %v47_v62  ;;  %v98_v13 = vmul.f32 0.125, %v54_v63 }
  0x21   :  { %v61_v18 = vadd.f32 %v60_v1, %v59_v59  ;;  %v68_v22 = vadd.f32 %v67_v2, %v66_v60  ;;  %v75_v23 = vadd.f32 %v74_v4, %v73_v61  ;;  %v81_v24 = vrot.slane %v80_v5, 1  ;;  %v1159_v1 = vld [vmem:[%s1236_s1 + $0x38] sm:$0xff] }
  0x22   :  { %v87_v28 = vadd.f32 %v86_v8, %v85_v29  ;;  %v94_v30 = vadd.f32 %v93_v9, %v92_v0  ;;  %v391_v31 = vsel %vm297_vm2, %v98_v13, %v97_v10  ;;  %v868_v32 = vpack.c.bf16 %v1079_v7, %v1074_v6 }
  0x23   :  { %v82_v35 = vadd.f32 %v81_v24, %v80_v5  ;;  %v99_v36 = vmul.f32 0.125, %v61_v18  ;;  %v100_v12 = vmul.f32 0.125, %v68_v22  ;;  %v101_v37 = vmul.f32 0.125, %v75_v23 }
  0x24   :  { %v88_v14 = vrot.slane %v87_v28, 1  ;;  %v95_v38 = vrot.slane %v94_v30, 1  ;;  %v865_v39 = vpack.c.bf16 %v473_v25, %v472_v17  ;;  %v871_v40 = vpack.c.bf16 %v1095_v27, %v1090_v26 }
  0x25   :  { %v102_v43 = vmul.f32 0.125, %v82_v35  ;;  %v392_v44 = vsel %vm299_vm3, %v99_v36, %v391_v31  ;;  %v105_v15 = vsel %vm40_vm0, %v1103_v33, 0.0  ;;  %v112_v16 = vsel %vm40_vm0, %v1108_v34, 0.0 }
  0x26   :  { %v89_v19 = vadd.f32 %v88_v14, %v87_v28  ;;  %v96_v45 = vadd.f32 %v95_v38, %v94_v30  ;;  %v393_v46 = vsel %vm301_vm4, %v100_v12, %v392_v44  ;;  %866 = vmatpush3.bf16.msra.mxu0 %v865_v39  ;;  %v106_v48 = vrot.slane %v105_v15, 4 }
  0x27   :  { %v394_v49 = vsel %vm303_vm5, %v101_v37, %v393_v46  ;;  %v113_v51 = vrot.slane %v112_v16, 4  ;;  %v119_v52 = vsel %vm40_vm0, %v1115_v41, 0.0  ;;  %v126_v20 = vsel %vm40_vm0, %v1120_v42, 0.0  ;;  %873 = vmatprep.subr.bf16.mxu0 %v909_v3 }
  0x28   :  { %v103_v53 = vmul.f32 0.125, %v89_v19  ;;  %v104_v54 = vmul.f32 0.125, %v96_v45  ;;  %v395_v55 = vsel %vm305_vm6, %v102_v43, %v394_v49  ;;  %v107_v56 = vadd.f32 %v106_v48, %v105_v15 }
  0x29   :  { %v114_v58 = vadd.f32 %v113_v51, %v112_v16  ;;  %v120_v59 = vrot.slane %v119_v52, 4  ;;  %v127_v60 = vrot.slane %v126_v20, 4  ;;  %v133_v61 = vsel %vm40_vm0, %v1131_v47, 0.0 }
  0x2a   :  { %v396_v21 = vsel %vm307_vm7, %v103_v53, %v395_v55  ;;  %v108_v62 = vrot.slane %v107_v56, 2  ;;  %v134_v63 = vrot.slane %v133_v61, 4  ;;  %v140_v29 = vsel %vm40_vm0, %v1137_v50, 0.0 }
  0x2b   :  { %v397_v0 = vsel %vm309_vm8, %v104_v54, %v396_v21  ;;  %v115_v2 = vrot.slane %v114_v58, 2  ;;  %v121_v4 = vadd.f32 %v120_v59, %v119_v52  ;;  %v128_v5 = vadd.f32 %v127_v60, %v126_v20 }
  0x2c   :  { %814 = vmatmul.mubr.msk.f32.vlgmr.msra.gmra.mrb[0].mxu1 %vm40_vm0, %v397_v0  ;;  %v109_v6 = vadd.f32 %v108_v62, %v107_v56  ;;  %v135_v7 = vadd.f32 %v134_v63, %v133_v61  ;;  %v141_v8 = vrot.slane %v140_v29, 4  ;;  %v147_v9 = vsel %vm40_vm0, %v1148_v57, 0.0 }
  0x2d   :  { %869 = vmatpush3.bf16.msra.mxu1 %v868_v32  ;;  %v116_v10 = vadd.f32 %v115_v2, %v114_v58  ;;  %v122_v13 = vrot.slane %v121_v4, 2  ;;  %v129_v17 = vrot.slane %v128_v5, 2  ;;  %v148_v18 = vrot.slane %v147_v9, 4  ;;  %835 = vmatprep.mubr.msk.f32.mxu1 %vm910_vm1, %v911_v11 }
  0x2e   :  { %870 = vmatprep.subr.bf16.mxu1 %v909_v3  ;;  %v110_v22 = vrot.slane %v109_v6, 1  ;;  %v136_v23 = vrot.slane %v135_v7, 2  ;;  %v142_v24 = vadd.f32 %v141_v8, %v140_v29  ;;  %v154_v25 = vsel %vm40_vm0, %v1159_v1, 0.0 }
  0x2f   :  { %v117_v26 = vrot.slane %v116_v10, 1  ;;  %v123_v27 = vadd.f32 %v122_v13, %v121_v4  ;;  %v130_v28 = vadd.f32 %v129_v17, %v128_v5  ;;  %v149_v30 = vadd.f32 %v148_v18, %v147_v9 }
  0x30   :  { %v111_v31 = vadd.f32 %v110_v22, %v109_v6  ;;  %v137_v32 = vadd.f32 %v136_v23, %v135_v7  ;;  %v143_v35 = vrot.slane %v142_v24, 2  ;;  %v155_v36 = vrot.slane %v154_v25, 4 }
  0x31   :  { %872 = vmatpush3.bf16.msra.mxu1 %v871_v40  ;;  %v118_v12 = vadd.f32 %v117_v26, %v116_v10  ;;  %v124_v37 = vrot.slane %v123_v27, 1  ;;  %v131_v14 = vrot.slane %v130_v28, 1  ;;  %v150_v38 = vrot.slane %v149_v30, 2 }
  0x32   :  { %v138_v39 = vrot.slane %v137_v32, 1  ;;  %v144_v43 = vadd.f32 %v143_v35, %v142_v24  ;;  %v156_v44 = vadd.f32 %v155_v36, %v154_v25  ;;  %v161_v15 = vmul.f32 0.125, %v111_v31 }
  0x33   :  { %v125_v16 = vadd.f32 %v124_v37, %v123_v27  ;;  %v132_v19 = vadd.f32 %v131_v14, %v130_v28  ;;  %v151_v45 = vadd.f32 %v150_v38, %v149_v30  ;;  %v162_v46 = vmul.f32 0.125, %v118_v12 }
  0x34   :  { %v139_v48 = vadd.f32 %v138_v39, %v137_v32  ;;  %v145_v49 = vrot.slane %v144_v43, 1  ;;  %v157_v51 = vrot.slane %v156_v44, 2  ;;  %v225_v52 = vsel %vm40_vm0, %v1103_v33, -inf }
  0x35   :  { %v152_v20 = vrot.slane %v151_v45, 1  ;;  %v163_v40 = vmul.f32 0.125, %v125_v16  ;;  %v164_v53 = vmul.f32 0.125, %v132_v19  ;;  %v482_v54 = vsel %vm297_vm2, %v162_v46, %v161_v15 }
  0x36   :  { %v146_v55 = vadd.f32 %v145_v49, %v144_v43  ;;  %v158_v56 = vadd.f32 %v157_v51, %v156_v44  ;;  %v165_v58 = vmul.f32 0.125, %v139_v48  ;;  %v226_v59 = vrot.slane %v225_v52, 4 }
  0x37   :  { %v153_v60 = vadd.f32 %v152_v20, %v151_v45  ;;  %v483_v61 = vsel %vm299_vm3, %v163_v40, %v482_v54  ;;  %v232_v21 = vsel %vm40_vm0, %v1108_v34, -inf  ;;  %v239_v62 = vsel %vm40_vm0, %v1115_v41, -inf }
  0x38   :  { %v159_v63 = vrot.slane %v158_v56, 1  ;;  %v166_v33 = vmul.f32 0.125, %v146_v55  ;;  %v484_v29 = vsel %vm301_vm4, %v164_v53, %v483_v61  ;;  %v227_v0 = vmax.f32 %v225_v52, %v226_v59 }
  0x39   :  { %v167_v2 = vmul.f32 0.125, %v153_v60  ;;  %v485_v4 = vsel %vm303_vm5, %v165_v58, %v484_v29  ;;  %v233_v5 = vrot.slane %v232_v21, 4  ;;  %v240_v6 = vrot.slane %v239_v62, 4 }
  0x3a   :  { %v160_v7 = vadd.f32 %v159_v63, %v158_v56  ;;  %v486_v8 = vsel %vm305_vm6, %v166_v33, %v485_v4  ;;  %v228_v9 = vrot.slane %v227_v0, 2  ;;  %v246_v34 = vsel %vm40_vm0, %v1120_v42, -inf }
  0x3b   :  { %v487_v10 = vsel %vm307_vm7, %v167_v2, %v486_v8  ;;  %v234_v41 = vmax.f32 %v232_v21, %v233_v5  ;;  %v241_v13 = vmax.f32 %v239_v62, %v240_v6  ;;  %v247_v17 = vrot.slane %v246_v34, 4  ;;  %v663_v5 = vld [vmem:[%s1239_s4] sm:$0xff]  ;;  %v664_v6 = vld [vmem:[%s1239_s4 + $0x8] sm:$0xff] }
  0x3c   :  { %v168_v18 = vmul.f32 0.125, %v160_v7  ;;  %v229_v22 = vmax.f32 %v227_v0, %v228_v9  ;;  %v253_v23 = vsel %vm40_vm0, %v1131_v47, -inf  ;;  %v260_v24 = vsel %vm40_vm0, %v1137_v50, -inf  ;;  %v665_v7 = vld [vmem:[%s1239_s4 + $0x10] sm:$0xff]  ;;  %v666_v9 = vld [vmem:[%s1239_s4 + $0x18] sm:$0xff] }
  0x3d   :  { %v235_v25 = vrot.slane %v234_v41, 2  ;;  %v242_v26 = vrot.slane %v241_v13, 2  ;;  %v248_v27 = vmax.f32 %v246_v34, %v247_v17  ;;  %v254_v28 = vrot.slane %v253_v23, 4 }
  0x3e   :  { %v488_v30 = vsel %vm309_vm8, %v168_v18, %v487_v10  ;;  %v230_v42 = vrot.slane %v229_v22, 1  ;;  %v261_v31 = vrot.slane %v260_v24, 4  ;;  %v267_v32 = vsel %vm40_vm0, %v1148_v57, -inf }
  0x3f   :  { %825 = vmatmul.mubr.msk.f32.vlgmr.msra.gmra.mrb[2].mxu0 %vm40_vm0, %v488_v30  ;;  %v236_v35 = vmax.f32 %v234_v41, %v235_v25  ;;  %v243_v36 = vmax.f32 %v241_v13, %v242_v26  ;;  %v249_v12 = vrot.slane %v248_v27, 2  ;;  %v255_v47 = vmax.f32 %v253_v23, %v254_v28  ;;  %v766_v26 = vld [vmem:[%s1238_s3] ss:$0 sm:$0xff] }
  0x40   :  { %v231_v37 = vmax.f32 %v229_v22, %v230_v42  ;;  %v262_v14 = vmax.f32 %v260_v24, %v261_v31  ;;  %v268_v50 = vrot.slane %v267_v32, 4  ;;  %v274_v38 = vsel %vm40_vm0, %v1159_v1, -inf  ;;  %846 = vmatprep.mubr.msk.f32.mxu0 %vm910_vm1, %v911_v11 }
  0x41   :  { %v237_v39 = vrot.slane %v236_v35, 1  ;;  %v244_v43 = vrot.slane %v243_v36, 1  ;;  %v250_v44 = vmax.f32 %v248_v27, %v249_v12  ;;  %v256_v15 = vrot.slane %v255_v47, 2 }
  0x42   :  { %v263_v57 = vrot.slane %v262_v14, 2  ;;  %v269_v16 = vmax.f32 %v267_v32, %v268_v50  ;;  %v275_v19 = vrot.slane %v274_v38, 4  ;;  %v874_v8 = vpack.c.bf16 %v664_v6, %v663_v5 }
  0x43   :  { %v238_v45 = vmax.f32 %v236_v35, %v237_v39  ;;  %v245_v46 = vmax.f32 %v243_v36, %v244_v43  ;;  %v251_v48 = vrot.slane %v250_v44, 1  ;;  %v257_v49 = vmax.f32 %v255_v47, %v256_v15 }
  0x44   :  { %v264_v51 = vmax.f32 %v262_v14, %v263_v57  ;;  %v270_v52 = vrot.slane %v269_v16, 2  ;;  %v276_v20 = vmax.f32 %v274_v38, %v275_v19  ;;  %875 = vmatpush3.bf16.msra.mxu0 %v874_v8  ;;  %v877_v34 = vpack.c.bf16 %v666_v9, %v665_v7 }
  0x45   :  { %v252_v40 = vmax.f32 %v250_v44, %v251_v48  ;;  %v258_v53 = vrot.slane %v257_v49, 1  ;;  %v574_v1 = vsel %vm297_vm2, %v238_v45, %v231_v37  ;;  %876 = vmatprep.subr.bf16.mxu0 %v909_v3  ;;  %v767_v3 = vld [vmem:[%s1240_s5] ss:$0 sm:$0xff] }
  0x46   :  { %v265_v54 = vrot.slane %v264_v51, 1  ;;  %v271_v11 = vmax.f32 %v269_v16, %v270_v52  ;;  %v277_v55 = vrot.slane %v276_v20, 2  ;;  %v575_v56 = vsel %vm299_vm3, %v245_v46, %v574_v1 }
  0x47   :  { %v259_v58 = vmax.f32 %v257_v49, %v258_v53  ;;  %v576_v59 = vsel %vm301_vm4, %v252_v40, %v575_v56 }
  0x48   :  { %v266_v60 = vmax.f32 %v264_v51, %v265_v54  ;;  %v272_v61 = vrot.slane %v271_v11, 1  ;;  %v278_v21 = vmax.f32 %v276_v20, %v277_v55  ;;  %878 = vmatpush3.bf16.msra.mxu0 %v877_v34 }
  0x49   :  { %v577_v62 = vsel %vm303_vm5, %v259_v58, %v576_v59 }
  0x4a   :  { %v273_v63 = vmax.f32 %v271_v11, %v272_v61  ;;  %v279_v33 = vrot.slane %v278_v21, 1  ;;  %v578_v29 = vsel %vm305_vm6, %v266_v60, %v577_v62 }
  0x4c   :  { %v280_v0 = vmax.f32 %v278_v21, %v279_v33  ;;  %v579_v2 = vsel %vm307_vm7, %v273_v63, %v578_v29 }
  0x4e   :  { %v580_v4 = vsel %vm309_vm8, %v280_v0, %v579_v2 }
  0x4f   :  { %836 = vmatmul.mubr.msk.f32.vlgmr.msra.gmra.mrb[2].mxu1 %vm40_vm0, %v580_v4 }
  0xec   :  { %v379_v10 = vpop.f32.mrb[0].mxu0 }
  0xed   :  { %v804_v41 = vpop.f32.mrb[1].mxu0 }
  0xff   :  { %v466_v13 = vpop.f32.mrb[0].mxu1 }
 0x100   :  { %v467_v17 = vadd.f32 %v466_v13, %v379_v10  ;;  %v815_v18 = vpop.f32.mrb[1].mxu1 }
 0x112   :  { %v557_v22 = vpop.f32.mrb[2].mxu0 }
 0x113   :  { %v561_v23 = vadd.f32 %v557_v22, %v467_v17  ;;  %v826_v24 = vpop.f32.mrb[3].mxu0 }
 0x122   :  { %v649_v25 = vpop.f32.mrb[2].mxu1 }
 0x123   :  { %v653_v27 = vadd.f32 %v649_v25, %v561_v23  ;;  %v837_v28 = vpop.f32.mrb[3].mxu1 }
 0x125   :  { %v661_v30 = vadd.f32 %v766_v26, %v653_v27 }
 0x127   :  { %883 = vtanh.f32 %v661_v30 }
 0x131   :  { %v884_v42 = vpop.eup %883 }
 0x132   :  { %847 = vmatmul.mubr.msk.f32.vlgmr.msra.gmra.mrb[4].mxu0 %vm40_vm0, %v884_v42 }
 0x205   :  { %v743_v31 = vpop.f32.mrb[4].mxu0 }
 0x206   :  { %v744_v32 = vadd.f32 %v767_v3, %v743_v31  ;;  %v848_v35 = vpop.f32.mrb[5].mxu0 }
 0x208   :  { %747 = vst [vmem:[#allocation2] sm:$0xff] %v744_v32 }
 0x209   :  { %896 = shalt.err (!%p893_p4)
}
 0x20a   :  { %s897_s2 = scalar_lea.hbm %s1241_s6, 128 }
 0x20b   :  { %p898_p5 = scmp.ne.s32.totalorder %s1241_s6, %s897_s2  ;;  %p901_p6 = scmp.lt.u32.totalorder %s897_s2, %s1241_s6 }
 0x20d   :  { %p903_p7 = pnand %p901_p6, %p898_p5 }
 0x20f   :  { %906 = shalt.err (!%p903_p7)
}
 0x210   :  { %757 = dma.vmem_to_hbm [thread:$0]  %s755_s21, 128, %s1241_s6, [#allocation3]  }
 0x211   :  { %907 = dma.done.wait [#allocation3], 128  }
 0x212   :  { %908 = vsyncadd [#allocation3], 4294967168 }
 0x213   :  { %761 = vsyncpa [#allocation3], 1 }

// kernel: tpu_custom_call.1
= control target key start
LH: loop header
LB: loop body
LE: loop exit
PB: predicated region body
PF: predicated region fallthrough
CT: control target
= control target key end

     0   :  { %v909_v3 = vmov 0.0|0.0   ;;  %vm40_vm0 = vcmask 261120   ;;  %vm910_vm1 = vmmov 0   ;;  %v911_v11 = vmov 0.0   ;;  %s1235_s0 = inlined_call_operand.vmem [shape: f32[8,8,32], index: 0, kind: input, shape index: {}]   ;;  %s1236_s1 = inlined_call_operand.vmem [shape: f32[8,8,32], index: 1, kind: input, shape index: {}]   ;;  %s1237_s2 = inlined_call_operand.vmem [shape: f32[128,32], index: 2, kind: input, shape index: {}]   ;;  %s1238_s3 = inlined_call_operand.vmem [shape: f32[1,32], index: 3, kind: input, shape index: {}]   ;;  %s1239_s4 = inlined_call_operand.vmem [shape: f32[32,128], index: 4, kind: input, shape index: {}]   ;;  %s1240_s5 = inlined_call_operand.vmem [shape: f32[1,128], index: 5, kind: input, shape index: {}]   ;;  %s1241_s6 = inlined_call_operand.hbm [shape: f32[8,128], index: 6, kind: output, shape index: {}]  }
   0x1   :  { %v285_v0 = vld [vmem:[%s1237_s2 + $0x20] sm:$0xff]  ;;  %v286_v1 = vld [vmem:[%s1237_s2 + $0x28] sm:$0xff]  ;;  %849 = vmatprep.subr.bf16.mxu0 %v909_v3  ;;  %855 = vmatprep.subr.bf16.mxu1 %v909_v3  ;;  %v287_v6 = vld [vmem:[%s1237_s2 + $0x30] sm:$0xff]  ;;  %vm297_vm2 = vcmask 1041409   ;;  %vm299_vm3 = vcmask 1042434   ;;  %vm301_vm4 = vcmask 1043459  }
   0x2   :  { %v281_v2 = vld [vmem:[%s1237_s2] sm:$0xff]  ;;  %v850_v4 = vpack.c.bf16 %v286_v1, %v285_v0  ;;  %v282_v5 = vld [vmem:[%s1237_s2 + $0x8] sm:$0xff]  ;;  %v288_v7 = vld [vmem:[%s1237_s2 + $0x38] sm:$0xff]  ;;  %802 = vmatprep.mubr.msk.f32.mxu0 %vm910_vm1, %v911_v11  ;;  %813 = vmatprep.mubr.msk.f32.mxu1 %vm910_vm1, %v911_v11  ;;  %vm303_vm5 = vcmask 1044484   ;;  %vm305_vm6 = vcmask 1045509   ;;  %vm307_vm7 = vcmask 1046534  }
   0x3   :  { %v856_v8 = vpack.c.bf16 %v282_v5, %v281_v2  ;;  %v283_v9 = vld [vmem:[%s1237_s2 + $0x10] sm:$0xff]  ;;  %v284_v10 = vld [vmem:[%s1237_s2 + $0x18] sm:$0xff]  ;;  %v979_v12 = vld [vmem:[%s1235_s0] sm:$0xff]  ;;  %v853_v13 = vpack.c.bf16 %v288_v7, %v287_v6 }
   0x4   :  { %851 = vmatpush3.bf16.msra.mxu0 %v850_v4  ;;  %v986_v14 = vld [vmem:[%s1235_s0 + $0x8] sm:$0xff]  ;;  %v991_v15 = vld [vmem:[%s1235_s0 + $0x10] sm:$0xff]  ;;  %v996_v16 = vld [vmem:[%s1235_s0 + $0x18] sm:$0xff]  ;;  %v169_v17 = vsel %vm40_vm0, %v979_v12, -inf  ;;  %v859_v18 = vpack.c.bf16 %v284_v10, %v283_v9 }
   0x5   :  { %857 = vmatpush3.bf16.msra.mxu1 %v856_v8  ;;  %852 = vmatprep.subr.bf16.mxu0 %v909_v3  ;;  %v1004_v19 = vld [vmem:[%s1235_s0 + $0x20] sm:$0xff]  ;;  %v1009_v20 = vld [vmem:[%s1235_s0 + $0x28] sm:$0xff]  ;;  %v1014_v21 = vld [vmem:[%s1235_s0 + $0x30] sm:$0xff]  ;;  %v170_v22 = vrot.slane %v169_v17, 4  ;;  %v176_v23 = vsel %vm40_vm0, %v986_v14, -inf  ;;  %v183_v24 = vsel %vm40_vm0, %v991_v15, -inf }
   0x6   :  { %858 = vmatprep.subr.bf16.mxu1 %v909_v3  ;;  %v177_v25 = vrot.slane %v176_v23, 4  ;;  %v184_v26 = vrot.slane %v183_v24, 4  ;;  %v190_v27 = vsel %vm40_vm0, %v996_v16, -inf  ;;  %v197_v28 = vsel %vm40_vm0, %v1004_v19, -inf  ;;  %v1028_v29 = vld [vmem:[%s1235_s0 + $0x38] sm:$0xff] }
   0x7   :  { %v171_v30 = vmax.f32 %v169_v17, %v170_v22  ;;  %v191_v31 = vrot.slane %v190_v27, 4  ;;  %v198_v32 = vrot.slane %v197_v28, 4  ;;  %v204_v33 = vsel %vm40_vm0, %v1009_v20, -inf }
   0x8   :  { %854 = vmatpush3.bf16.msra.mxu0 %v853_v13  ;;  %v178_v34 = vmax.f32 %v176_v23, %v177_v25  ;;  %v185_v35 = vmax.f32 %v183_v24, %v184_v26  ;;  %v205_v36 = vrot.slane %v204_v33, 4  ;;  %v211_v37 = vsel %vm40_vm0, %v1014_v21, -inf }
   0x9   :  { %860 = vmatpush3.bf16.msra.mxu1 %v859_v18  ;;  %861 = vmatprep.subr.bf16.mxu0 %v909_v3  ;;  %v172_v38 = vrot.slane %v171_v30, 2  ;;  %v192_v39 = vmax.f32 %v190_v27, %v191_v31  ;;  %v199_v40 = vmax.f32 %v197_v28, %v198_v32  ;;  %v212_v41 = vrot.slane %v211_v37, 4 }
   0xa   :  { %v179_v42 = vrot.slane %v178_v34, 2  ;;  %v186_v43 = vrot.slane %v185_v35, 2  ;;  %v206_v44 = vmax.f32 %v204_v33, %v205_v36  ;;  %v218_v45 = vsel %vm40_vm0, %v1028_v29, -inf  ;;  %867 = vmatprep.subr.bf16.mxu1 %v909_v3 }
   0xb   :  { %v173_v46 = vmax.f32 %v171_v30, %v172_v38  ;;  %v193_v47 = vrot.slane %v192_v39, 2  ;;  %v200_v48 = vrot.slane %v199_v40, 2  ;;  %v213_v49 = vmax.f32 %v211_v37, %v212_v41 }
   0xc   :  { %v180_v50 = vmax.f32 %v178_v34, %v179_v42  ;;  %v187_v51 = vmax.f32 %v185_v35, %v186_v43  ;;  %v207_v52 = vrot.slane %v206_v44, 2  ;;  %v219_v53 = vrot.slane %v218_v45, 4 }
   0xd   :  { %11 = vsyncpa [#allocation3], 0  ;;  %v174_v54 = vrot.slane %v173_v46, 1  ;;  %v194_v55 = vmax.f32 %v192_v39, %v193_v47  ;;  %v201_v56 = vmax.f32 %v199_v40, %v200_v48  ;;  %v214_v57 = vrot.slane %v213_v49, 2  ;;  %v470_v2 = vld [vmem:[%s1237_s2 + $0x40] sm:$0xff]  ;;  %v471_v4 = vld [vmem:[%s1237_s2 + $0x48] sm:$0xff] }
   0xe   :  { %v181_v58 = vrot.slane %v180_v50, 1  ;;  %v188_v59 = vrot.slane %v187_v51, 1  ;;  %v208_v60 = vmax.f32 %v206_v44, %v207_v52  ;;  %v220_v61 = vmax.f32 %v218_v45, %v219_v53  ;;  %s912_s20 = smov [#allocation2]  }
   0xf   :  { %v175_v62 = vmax.f32 %v173_v46, %v174_v54  ;;  %v195_v63 = vrot.slane %v194_v55, 1  ;;  %v202_v0 = vrot.slane %v201_v56, 1  ;;  %v215_v1 = vmax.f32 %v213_v49, %v214_v57  ;;  %s754_s21 = sshll.u32 %s912_s20, 4  ;;  %s755_s21 = int_to_ptr.vmem [resolvable:$true] %s754_s21 }
  0x10   :  { %v182_v5 = vmax.f32 %v180_v50, %v181_v58  ;;  %v189_v6 = vmax.f32 %v187_v51, %v188_v59  ;;  %v209_v7 = vrot.slane %v208_v60, 1  ;;  %v221_v8 = vrot.slane %v220_v61, 2  ;;  %s885_s22 = scalar_lea.vmem %s755_s21, 128  ;;  %p890_p1 = scmp.lt.s32.totalorder %s755_s21, %s755_s21 }
  0x11   :  { %v196_v9 = vmax.f32 %v194_v55, %v195_v63  ;;  %v203_v10 = vmax.f32 %v201_v56, %v202_v0  ;;  %v216_v13 = vrot.slane %v215_v1, 1  ;;  %vm309_vm8 = vcmask 1047559   ;;  %p886_p0 = scmp.ne.s32.totalorder %s755_s21, %s885_s22  ;;  %p891_p2 = scmp.lt.s32.totalorder %s885_s22, %s885_s22 }
  0x12   :  { %v210_v17 = vmax.f32 %v208_v60, %v209_v7  ;;  %v222_v18 = vmax.f32 %v220_v61, %v221_v8  ;;  %v298_v22 = vsel %vm297_vm2, %v182_v5, %v175_v62  ;;  %v862_v23 = vpack.c.bf16 %v471_v4, %v470_v2  ;;  %v1079_v7 = vld [vmem:[%s1237_s2 + $0x68] sm:$0xff] }
  0x13   :  { %v217_v24 = vmax.f32 %v215_v1, %v216_v13  ;;  %v300_v25 = vsel %vm299_vm3, %v189_v6, %v298_v22  ;;  %v41_v26 = vsel %vm40_vm0, %v979_v12, 0.0  ;;  %v48_v27 = vsel %vm40_vm0, %v986_v14, 0.0  ;;  %v1074_v6 = vld [vmem:[%s1237_s2 + $0x60] sm:$0xff]  ;;  %p892_p3 = por %p891_p2, %p890_p1 }
  0x14   :  { %v223_v28 = vrot.slane %v222_v18, 1  ;;  %v302_v30 = vsel %vm301_vm4, %v196_v9, %v300_v25  ;;  %v42_v31 = vrot.slane %v41_v26, 4  ;;  %v49_v32 = vrot.slane %v48_v27, 4  ;;  %v473_v25 = vld [vmem:[%s1237_s2 + $0x58] sm:$0xff] }
  0x15   :  { %v304_v33 = vsel %vm303_vm5, %v203_v10, %v302_v30  ;;  %v55_v34 = vsel %vm40_vm0, %v991_v15, 0.0  ;;  %v62_v35 = vsel %vm40_vm0, %v996_v16, 0.0  ;;  %v69_v36 = vsel %vm40_vm0, %v1004_v19, 0.0  ;;  %p893_p4 = pnand %p892_p3, %p886_p0 }
  0x16   :  { %v224_v12 = vmax.f32 %v222_v18, %v223_v28  ;;  %v306_v37 = vsel %vm305_vm6, %v210_v17, %v304_v33  ;;  %v43_v14 = vadd.f32 %v42_v31, %v41_v26  ;;  %v50_v38 = vadd.f32 %v49_v32, %v48_v27  ;;  %v472_v17 = vld [vmem:[%s1237_s2 + $0x50] sm:$0xff]  ;;  %v1095_v27 = vld [vmem:[%s1237_s2 + $0x78] sm:$0xff]  ;;  %v1103_v33 = vld [vmem:[%s1236_s1] sm:$0xff] }
  0x17   :  { %v308_v39 = vsel %vm307_vm7, %v217_v24, %v306_v37  ;;  %v56_v40 = vrot.slane %v55_v34, 4  ;;  %v63_v41 = vrot.slane %v62_v35, 4  ;;  %v70_v42 = vrot.slane %v69_v36, 4  ;;  %v1090_v26 = vld [vmem:[%s1237_s2 + $0x70] sm:$0xff] }
  0x18   :  { %v310_v43 = vsel %vm309_vm8, %v224_v12, %v308_v39  ;;  %v44_v44 = vrot.slane %v43_v14, 2  ;;  %v51_v15 = vrot.slane %v50_v38, 2  ;;  %v76_v16 = vsel %vm40_vm0, %v1009_v20, 0.0 }
  0x19   :  { %803 = vmatmul.mubr.msk.f32.vlgmr.msra.gmra.mrb[0].mxu0 %vm40_vm0, %v310_v43  ;;  %v57_v19 = vadd.f32 %v56_v40, %v55_v34  ;;  %v64_v45 = vadd.f32 %v63_v41, %v62_v35  ;;  %v71_v46 = vadd.f32 %v70_v42, %v69_v36  ;;  %v77_v47 = vrot.slane %v76_v16, 4  ;;  %v1108_v34 = vld [vmem:[%s1236_s1 + $0x8] sm:$0xff]  ;;  %v1115_v41 = vld [vmem:[%s1236_s1 + $0x10] sm:$0xff]  ;;  %v1120_v42 = vld [vmem:[%s1236_s1 + $0x18] sm:$0xff] }
  0x1a   :  { %863 = vmatpush3.bf16.msra.mxu0 %v862_v23  ;;  %v45_v48 = vadd.f32 %v44_v44, %v43_v14  ;;  %v52_v49 = vadd.f32 %v51_v15, %v50_v38  ;;  %v83_v50 = vsel %vm40_vm0, %v1014_v21, 0.0  ;;  %v90_v51 = vsel %vm40_vm0, %v1028_v29, 0.0  ;;  %824 = vmatprep.mubr.msk.f32.mxu0 %vm910_vm1, %v911_v11 }
  0x1b   :  { %v58_v52 = vrot.slane %v57_v19, 2  ;;  %v65_v20 = vrot.slane %v64_v45, 2  ;;  %v72_v53 = vrot.slane %v71_v46, 2  ;;  %v78_v54 = vadd.f32 %v77_v47, %v76_v16  ;;  %864 = vmatprep.subr.bf16.mxu0 %v909_v3  ;;  %v1131_v47 = vld [vmem:[%s1236_s1 + $0x20] sm:$0xff] }
  0x1c   :  { %v46_v55 = vrot.slane %v45_v48, 1  ;;  %v53_v56 = vrot.slane %v52_v49, 1  ;;  %v84_v57 = vrot.slane %v83_v50, 4  ;;  %v91_v58 = vrot.slane %v90_v51, 4 }
  0x1d   :  { %v59_v59 = vadd.f32 %v58_v52, %v57_v19  ;;  %v66_v60 = vadd.f32 %v65_v20, %v64_v45  ;;  %v73_v61 = vadd.f32 %v72_v53, %v71_v46  ;;  %v79_v21 = vrot.slane %v78_v54, 2 }
  0x1e   :  { %v47_v62 = vadd.f32 %v46_v55, %v45_v48  ;;  %v54_v63 = vadd.f32 %v53_v56, %v52_v49  ;;  %v85_v29 = vadd.f32 %v84_v57, %v83_v50  ;;  %v92_v0 = vadd.f32 %v91_v58, %v90_v51  ;;  %v1137_v50 = vld [vmem:[%s1236_s1 + $0x28] sm:$0xff]  ;;  %v1148_v57 = vld [vmem:[%s1236_s1 + $0x30] sm:$0xff] }
  0x1f   :  { %v60_v1 = vrot.slane %v59_v59, 1  ;;  %v67_v2 = vrot.slane %v66_v60, 1  ;;  %v74_v4 = vrot.slane %v73_v61, 1  ;;  %v80_v5 = vadd.f32 %v79_v21, %v78_v54 }
  0x20   :  { %v86_v8 = vrot.slane %v85_v29, 2  ;;  %v93_v9 = vrot.slane %v92_v0, 2  ;;  %v97_v10 = vmul.f32 0.125, %v47_v62  ;;  %v98_v13 = vmul.f32 0.125, %v54_v63 }
  0x21   :  { %v61_v18 = vadd.f32 %v60_v1, %v59_v59  ;;  %v68_v22 = vadd.f32 %v67_v2, %v66_v60  ;;  %v75_v23 = vadd.f32 %v74_v4, %v73_v61  ;;  %v81_v24 = vrot.slane %v80_v5, 1  ;;  %v1159_v1 = vld [vmem:[%s1236_s1 + $0x38] sm:$0xff] }
  0x22   :  { %v87_v28 = vadd.f32 %v86_v8, %v85_v29  ;;  %v94_v30 = vadd.f32 %v93_v9, %v92_v0  ;;  %v391_v31 = vsel %vm297_vm2, %v98_v13, %v97_v10  ;;  %v868_v32 = vpack.c.bf16 %v1079_v7, %v1074_v6 }
  0x23   :  { %v82_v35 = vadd.f32 %v81_v24, %v80_v5  ;;  %v99_v36 = vmul.f32 0.125, %v61_v18  ;;  %v100_v12 = vmul.f32 0.125, %v68_v22  ;;  %v101_v37 = vmul.f32 0.125, %v75_v23 }
  0x24   :  { %v88_v14 = vrot.slane %v87_v28, 1  ;;  %v95_v38 = vrot.slane %v94_v30, 1  ;;  %v865_v39 = vpack.c.bf16 %v473_v25, %v472_v17  ;;  %v871_v40 = vpack.c.bf16 %v1095_v27, %v1090_v26 }
  0x25   :  { %v102_v43 = vmul.f32 0.125, %v82_v35  ;;  %v392_v44 = vsel %vm299_vm3, %v99_v36, %v391_v31  ;;  %v105_v15 = vsel %vm40_vm0, %v1103_v33, 0.0  ;;  %v112_v16 = vsel %vm40_vm0, %v1108_v34, 0.0 }
  0x26   :  { %v89_v19 = vadd.f32 %v88_v14, %v87_v28  ;;  %v96_v45 = vadd.f32 %v95_v38, %v94_v30  ;;  %v393_v46 = vsel %vm301_vm4, %v100_v12, %v392_v44  ;;  %866 = vmatpush3.bf16.msra.mxu0 %v865_v39  ;;  %v106_v48 = vrot.slane %v105_v15, 4 }
  0x27   :  { %v394_v49 = vsel %vm303_vm5, %v101_v37, %v393_v46  ;;  %v113_v51 = vrot.slane %v112_v16, 4  ;;  %v119_v52 = vsel %vm40_vm0, %v1115_v41, 0.0  ;;  %v126_v20 = vsel %vm40_vm0, %v1120_v42, 0.0  ;;  %873 = vmatprep.subr.bf16.mxu0 %v909_v3 }
  0x28   :  { %v103_v53 = vmul.f32 0.125, %v89_v19  ;;  %v104_v54 = vmul.f32 0.125, %v96_v45  ;;  %v395_v55 = vsel %vm305_vm6, %v102_v43, %v394_v49  ;;  %v107_v56 = vadd.f32 %v106_v48, %v105_v15 }
  0x29   :  { %v114_v58 = vadd.f32 %v113_v51, %v112_v16  ;;  %v120_v59 = vrot.slane %v119_v52, 4  ;;  %v127_v60 = vrot.slane %v126_v20, 4  ;;  %v133_v61 = vsel %vm40_vm0, %v1131_v47, 0.0 }
  0x2a   :  { %v396_v21 = vsel %vm307_vm7, %v103_v53, %v395_v55  ;;  %v108_v62 = vrot.slane %v107_v56, 2  ;;  %v134_v63 = vrot.slane %v133_v61, 4  ;;  %v140_v29 = vsel %vm40_vm0, %v1137_v50, 0.0 }
  0x2b   :  { %v397_v0 = vsel %vm309_vm8, %v104_v54, %v396_v21  ;;  %v115_v2 = vrot.slane %v114_v58, 2  ;;  %v121_v4 = vadd.f32 %v120_v59, %v119_v52  ;;  %v128_v5 = vadd.f32 %v127_v60, %v126_v20 }
  0x2c   :  { %814 = vmatmul.mubr.msk.f32.vlgmr.msra.gmra.mrb[0].mxu1 %vm40_vm0, %v397_v0  ;;  %v109_v6 = vadd.f32 %v108_v62, %v107_v56  ;;  %v135_v7 = vadd.f32 %v134_v63, %v133_v61  ;;  %v141_v8 = vrot.slane %v140_v29, 4  ;;  %v147_v9 = vsel %vm40_vm0, %v1148_v57, 0.0 }
  0x2d   :  { %869 = vmatpush3.bf16.msra.mxu1 %v868_v32  ;;  %v116_v10 = vadd.f32 %v115_v2, %v114_v58  ;;  %v122_v13 = vrot.slane %v121_v4, 2  ;;  %v129_v17 = vrot.slane %v128_v5, 2  ;;  %v148_v18 = vrot.slane %v147_v9, 4  ;;  %835 = vmatprep.mubr.msk.f32.mxu1 %vm910_vm1, %v911_v11 }
  0x2e   :  { %870 = vmatprep.subr.bf16.mxu1 %v909_v3  ;;  %v110_v22 = vrot.slane %v109_v6, 1  ;;  %v136_v23 = vrot.slane %v135_v7, 2  ;;  %v142_v24 = vadd.f32 %v141_v8, %v140_v29  ;;  %v154_v25 = vsel %vm40_vm0, %v1159_v1, 0.0 }
  0x2f   :  { %v117_v26 = vrot.slane %v116_v10, 1  ;;  %v123_v27 = vadd.f32 %v122_v13, %v121_v4  ;;  %v130_v28 = vadd.f32 %v129_v17, %v128_v5  ;;  %v149_v30 = vadd.f32 %v148_v18, %v147_v9 }
  0x30   :  { %v111_v31 = vadd.f32 %v110_v22, %v109_v6  ;;  %v137_v32 = vadd.f32 %v136_v23, %v135_v7  ;;  %v143_v35 = vrot.slane %v142_v24, 2  ;;  %v155_v36 = vrot.slane %v154_v25, 4 }
  0x31   :  { %872 = vmatpush3.bf16.msra.mxu1 %v871_v40  ;;  %v118_v12 = vadd.f32 %v117_v26, %v116_v10  ;;  %v124_v37 = vrot.slane %v123_v27, 1  ;;  %v131_v14 = vrot.slane %v130_v28, 1  ;;  %v150_v38 = vrot.slane %v149_v30, 2 }
  0x32   :  { %v138_v39 = vrot.slane %v137_v32, 1  ;;  %v144_v43 = vadd.f32 %v143_v35, %v142_v24  ;;  %v156_v44 = vadd.f32 %v155_v36, %v154_v25  ;;  %v161_v15 = vmul.f32 0.125, %v111_v31 }
  0x33   :  { %v125_v16 = vadd.f32 %v124_v37, %v123_v27  ;;  %v132_v19 = vadd.f32 %v131_v14, %v130_v28  ;;  %v151_v45 = vadd.f32 %v150_v38, %v149_v30  ;;  %v162_v46 = vmul.f32 0.125, %v118_v12 }
  0x34   :  { %v139_v48 = vadd.f32 %v138_v39, %v137_v32  ;;  %v145_v49 = vrot.slane %v144_v43, 1  ;;  %v157_v51 = vrot.slane %v156_v44, 2  ;;  %v225_v52 = vsel %vm40_vm0, %v1103_v33, -inf }
  0x35   :  { %v152_v20 = vrot.slane %v151_v45, 1  ;;  %v163_v40 = vmul.f32 0.125, %v125_v16  ;;  %v164_v53 = vmul.f32 0.125, %v132_v19  ;;  %v482_v54 = vsel %vm297_vm2, %v162_v46, %v161_v15 }
  0x36   :  { %v146_v55 = vadd.f32 %v145_v49, %v144_v43  ;;  %v158_v56 = vadd.f32 %v157_v51, %v156_v44  ;;  %v165_v58 = vmul.f32 0.125, %v139_v48  ;;  %v226_v59 = vrot.slane %v225_v52, 4 }
  0x37   :  { %v153_v60 = vadd.f32 %v152_v20, %v151_v45  ;;  %v483_v61 = vsel %vm299_vm3, %v163_v40, %v482_v54  ;;  %v232_v21 = vsel %vm40_vm0, %v1108_v34, -inf  ;;  %v239_v62 = vsel %vm40_vm0, %v1115_v41, -inf }
  0x38   :  { %v159_v63 = vrot.slane %v158_v56, 1  ;;  %v166_v33 = vmul.f32 0.125, %v146_v55  ;;  %v484_v29 = vsel %vm301_vm4, %v164_v53, %v483_v61  ;;  %v227_v0 = vmax.f32 %v225_v52, %v226_v59 }
  0x39   :  { %v167_v2 = vmul.f32 0.125, %v153_v60  ;;  %v485_v4 = vsel %vm303_vm5, %v165_v58, %v484_v29  ;;  %v233_v5 = vrot.slane %v232_v21, 4  ;;  %v240_v6 = vrot.slane %v239_v62, 4 }
  0x3a   :  { %v160_v7 = vadd.f32 %v159_v63, %v158_v56  ;;  %v486_v8 = vsel %vm305_vm6, %v166_v33, %v485_v4  ;;  %v228_v9 = vrot.slane %v227_v0, 2  ;;  %v246_v34 = vsel %vm40_vm0, %v1120_v42, -inf }
  0x3b   :  { %v487_v10 = vsel %vm307_vm7, %v167_v2, %v486_v8  ;;  %v234_v41 = vmax.f32 %v232_v21, %v233_v5  ;;  %v241_v13 = vmax.f32 %v239_v62, %v240_v6  ;;  %v247_v17 = vrot.slane %v246_v34, 4  ;;  %v663_v5 = vld [vmem:[%s1239_s4] sm:$0xff]  ;;  %v664_v6 = vld [vmem:[%s1239_s4 + $0x8] sm:$0xff] }
  0x3c   :  { %v168_v18 = vmul.f32 0.125, %v160_v7  ;;  %v229_v22 = vmax.f32 %v227_v0, %v228_v9  ;;  %v253_v23 = vsel %vm40_vm0, %v1131_v47, -inf  ;;  %v260_v24 = vsel %vm40_vm0, %v1137_v50, -inf  ;;  %v665_v7 = vld [vmem:[%s1239_s4 + $0x10] sm:$0xff]  ;;  %v666_v9 = vld [vmem:[%s1239_s4 + $0x18] sm:$0xff] }
  0x3d   :  { %v235_v25 = vrot.slane %v234_v41, 2  ;;  %v242_v26 = vrot.slane %v241_v13, 2  ;;  %v248_v27 = vmax.f32 %v246_v34, %v247_v17  ;;  %v254_v28 = vrot.slane %v253_v23, 4 }
  0x3e   :  { %v488_v30 = vsel %vm309_vm8, %v168_v18, %v487_v10  ;;  %v230_v42 = vrot.slane %v229_v22, 1  ;;  %v261_v31 = vrot.slane %v260_v24, 4  ;;  %v267_v32 = vsel %vm40_vm0, %v1148_v57, -inf }
  0x3f   :  { %825 = vmatmul.mubr.msk.f32.vlgmr.msra.gmra.mrb[2].mxu0 %vm40_vm0, %v488_v30  ;;  %v236_v35 = vmax.f32 %v234_v41, %v235_v25  ;;  %v243_v36 = vmax.f32 %v241_v13, %v242_v26  ;;  %v249_v12 = vrot.slane %v248_v27, 2  ;;  %v255_v47 = vmax.f32 %v253_v23, %v254_v28  ;;  %v766_v26 = vld [vmem:[%s1238_s3] ss:$0 sm:$0xff] }
  0x40   :  { %v231_v37 = vmax.f32 %v229_v22, %v230_v42  ;;  %v262_v14 = vmax.f32 %v260_v24, %v261_v31  ;;  %v268_v50 = vrot.slane %v267_v32, 4  ;;  %v274_v38 = vsel %vm40_vm0, %v1159_v1, -inf  ;;  %846 = vmatprep.mubr.msk.f32.mxu0 %vm910_vm1, %v911_v11 }
  0x41   :  { %v237_v39 = vrot.slane %v236_v35, 1  ;;  %v244_v43 = vrot.slane %v243_v36, 1  ;;  %v250_v44 = vmax.f32 %v248_v27, %v249_v12  ;;  %v256_v15 = vrot.slane %v255_v47, 2 }
  0x42   :  { %v263_v57 = vrot.slane %v262_v14, 2  ;;  %v269_v16 = vmax.f32 %v267_v32, %v268_v50  ;;  %v275_v19 = vrot.slane %v274_v38, 4  ;;  %v874_v8 = vpack.c.bf16 %v664_v6, %v663_v5 }
  0x43   :  { %v238_v45 = vmax.f32 %v236_v35, %v237_v39  ;;  %v245_v46 = vmax.f32 %v243_v36, %v244_v43  ;;  %v251_v48 = vrot.slane %v250_v44, 1  ;;  %v257_v49 = vmax.f32 %v255_v47, %v256_v15 }
  0x44   :  { %v264_v51 = vmax.f32 %v262_v14, %v263_v57  ;;  %v270_v52 = vrot.slane %v269_v16, 2  ;;  %v276_v20 = vmax.f32 %v274_v38, %v275_v19  ;;  %875 = vmatpush3.bf16.msra.mxu0 %v874_v8  ;;  %v877_v34 = vpack.c.bf16 %v666_v9, %v665_v7 }
  0x45   :  { %v252_v40 = vmax.f32 %v250_v44, %v251_v48  ;;  %v258_v53 = vrot.slane %v257_v49, 1  ;;  %v574_v1 = vsel %vm297_vm2, %v238_v45, %v231_v37  ;;  %876 = vmatprep.subr.bf16.mxu0 %v909_v3  ;;  %v767_v3 = vld [vmem:[%s1240_s5] ss:$0 sm:$0xff] }
  0x46   :  { %v265_v54 = vrot.slane %v264_v51, 1  ;;  %v271_v11 = vmax.f32 %v269_v16, %v270_v52  ;;  %v277_v55 = vrot.slane %v276_v20, 2  ;;  %v575_v56 = vsel %vm299_vm3, %v245_v46, %v574_v1 }
  0x47   :  { %v259_v58 = vmax.f32 %v257_v49, %v258_v53  ;;  %v576_v59 = vsel %vm301_vm4, %v252_v40, %v575_v56 }
  0x48   :  { %v266_v60 = vmax.f32 %v264_v51, %v265_v54  ;;  %v272_v61 = vrot.slane %v271_v11, 1  ;;  %v278_v21 = vmax.f32 %v276_v20, %v277_v55  ;;  %878 = vmatpush3.bf16.msra.mxu0 %v877_v34 }
  0x49   :  { %v577_v62 = vsel %vm303_vm5, %v259_v58, %v576_v59 }
  0x4a   :  { %v273_v63 = vmax.f32 %v271_v11, %v272_v61  ;;  %v279_v33 = vrot.slane %v278_v21, 1  ;;  %v578_v29 = vsel %vm305_vm6, %v266_v60, %v577_v62 }
  0x4c   :  { %v280_v0 = vmax.f32 %v278_v21, %v279_v33  ;;  %v579_v2 = vsel %vm307_vm7, %v273_v63, %v578_v29 }
  0x4e   :  { %v580_v4 = vsel %vm309_vm8, %v280_v0, %v579_v2 }
  0x4f   :  { %836 = vmatmul.mubr.msk.f32.vlgmr.msra.gmra.mrb[2].mxu1 %vm40_vm0, %v580_v4 }
  0xec   :  { %v379_v10 = vpop.f32.mrb[0].mxu0 }
  0xed   :  { %v804_v41 = vpop.f32.mrb[1].mxu0 }
  0xff   :  { %v466_v13 = vpop.f32.mrb[0].mxu1 }
 0x100   :  { %v467_v17 = vadd.f32 %v466_v13, %v379_v10  ;;  %v815_v18 = vpop.f32.mrb[1].mxu1 }
 0x112   :  { %v557_v22 = vpop.f32.mrb[2].mxu0 }
 0x113   :  { %v561_v23 = vadd.f32 %v557_v22, %v467_v17  ;;  %v826_v24 = vpop.f32.mrb[3].mxu0 }
 0x122   :  { %v649_v25 = vpop.f32.mrb[2].mxu1 }
 0x123   :  { %v653_v27 = vadd.f32 %v649_v25, %v561_v23  ;;  %v837_v28 = vpop.f32.mrb[3].mxu1 }
 0x125   :  { %v661_v30 = vadd.f32 %v766_v26, %v653_v27 }
 0x127   :  { %883 = vtanh.f32 %v661_v30 }
 0x131   :  { %v884_v42 = vpop.eup %883 }
 0x132   :  { %847 = vmatmul.mubr.msk.f32.vlgmr.msra.gmra.mrb[4].mxu0 %vm40_vm0, %v884_v42 }
 0x205   :  { %v743_v31 = vpop.f32.mrb[4].mxu0 }
 0x206   :  { %v744_v32 = vadd.f32 %v767_v3, %v743_v31  ;;  %v848_v35 = vpop.f32.mrb[5].mxu0 }
 0x208   :  { %747 = vst [vmem:[#allocation2] sm:$0xff] %v744_v32 }
 0x209   :  { %896 = shalt.err (!%p893_p4)
}
 0x20a   :  { %s897_s2 = scalar_lea.hbm %s1241_s6, 128 }
 0x20b   :  { %p898_p5 = scmp.ne.s32.totalorder %s1241_s6, %s897_s2  ;;  %p901_p6 = scmp.lt.u32.totalorder %s897_s2, %s1241_s6 }
 0x20d   :  { %p903_p7 = pnand %p901_p6, %p898_p5 }
 0x20f   :  { %906 = shalt.err (!%p903_p7)
}
 0x210   :  { %757 = dma.vmem_to_hbm [thread:$0]  %s755_s21, 128, %s1241_s6, [#allocation3]  }
 0x211   :  { %907 = dma.done.wait [#allocation3], 128  }
 0x212   :  { %908 = vsyncadd [#allocation3], 4294967168 }
 0x213   :  { %761 = vsyncpa [#allocation3], 1 }

</bundles_post_ra>
